<compile_context>
chip_gen: v7x
topology: tpu7x:2x2x1
jax: 0.10.0
libtpu: 0.0.40
codegen_flags: <defaults>
</compile_context>

<pallas_src>
import functools

import jax
import jax.numpy as jnp
from jax.experimental import pallas as pl
from jax.experimental.pallas import tpu as pltpu


def _round_up(x, m):
    return -(-x // m) * m


# ----------------------------------------------------------------------------
# Fused kernel: per-tile partial sums for
#   pixel SSD   = sum((output - target)**2)
#   feature SSD = sum((relu(conv3x3(output)) - relu(conv3x3(target)))**2)
#
#   o_ref, t_ref : (C, Gp)   G spatially zero-padded images, flattened and
#                            lane-aligned to Ppad per image (f32)
#   m_ref        : (1, Gp)   1.0 at interior (real-pixel) positions, else 0.0
#   w_ref        : (9, Cout, C) conv taps, tap index = kh*3 + kw
#   b_ref        : (Cout, 1) conv bias (broadcast over lanes)
#   out_ref      : (1, 2, 128) partials; [0,0,0] = pixel SSD, [0,1,0] = feat SSD
# ----------------------------------------------------------------------------
def _combined_kernel(o_ref, t_ref, m_ref, w_ref, b_ref, out_ref, *, wp, gp):
    o = o_ref[...]                                   # (C, Gp) f32
    t = t_ref[...]

    # ---- pixel-MSE partial ------------------------------------------------
    # Every padded / lane-slack position is zero in BOTH tensors, so summing
    # over the whole padded tile equals the sum over the original pixels.
    d = o - t
    pix_partial = jnp.sum(d * d)

    # ---- perceptual partial: 3x3 conv as 9 accumulated small dots ----------
    cout = w_ref.shape[1]
    acc_o = jnp.zeros((cout, gp), jnp.float32)
    acc_t = jnp.zeros((cout, gp), jnp.float32)
    for s_idx in range(9):
        kh, kw = divmod(s_idx, 3)
        s = (kh - 1) * wp + (kw - 1)                 # flat offset of this tap
        wk = w_ref[s_idx]                            # (Cout, C)
        if s == 0:
            ro, rt = o, t
        else:
            # shifted[p] = x[p + s]  (jnp.roll semantics; wrap-around only
            # lands on masked pad/slack positions).
            k = (-s) % gp
            ro = pltpu.roll(o, shift=k, axis=1)
            rt = pltpu.roll(t, shift=k, axis=1)
        acc_o = acc_o + jnp.dot(wk, ro, preferred_element_type=jnp.float32)
        acc_t = acc_t + jnp.dot(wk, rt, preferred_element_type=jnp.float32)

    bias = b_ref[...]                                # (Cout, 1)
    fo = jnp.maximum(acc_o + bias, 0.0)
    ft = jnp.maximum(acc_t + bias, 0.0)
    df = fo - ft
    feat_partial = jnp.sum(df * df * m_ref[...])     # mask kills invalid lanes

    # ---- emit per-tile partials (parallel grid axis, no accumulator) -------
    row = jax.lax.broadcasted_iota(jnp.int32, out_ref.shape, 1)  # (1, 2, 128)
    out_ref[...] = jnp.where(row == 0, pix_partial, feat_partial)


# ----------------------------------------------------------------------------
# CombinedLoss forward
# ----------------------------------------------------------------------------
@functools.partial(jax.jit, static_argnames=("alpha", "beta"))
def combined_loss(output, target, w_conv, b_conv, alpha=1.0, beta=0.1):
    B, C, H, W = output.shape
    Cout = w_conv.shape[0]
    Hp, Wp = H + 2, W + 2
    P = Hp * Wp                              # flat length of one padded image
    Ppad = _round_up(P, 128)                 # lane-aligned per-image stride

    def prep(x):
        # NCHW -> (C, B, Hp, Wp) with "same" zero padding, flatten spatial dims
        # and lane-align each image.  One cheap fused XLA pass; no 9x im2col.
        x = jnp.transpose(x, (1, 0, 2, 3)).astype(jnp.float32)
        x = jnp.pad(x, ((0, 0), (0, 0), (1, 1), (1, 1)))
        x = x.reshape(C, B, P)
        return jnp.pad(x, ((0, 0), (0, 0), (0, Ppad - P)))

    o3 = prep(output)                        # (C, B, Ppad)
    t3 = prep(target)

    # Images per grid step: ~1 MiB per input tile, but keep >= 2 tiles when
    # B >= 2 so both v7x TensorCores get work.  Zero-padded extra images
    # cancel exactly in both loss terms.
    bytes_per_img = C * Ppad * 4
    G = max(1, min(B, (1 << 20) // max(1, bytes_per_img)))
    if B >= 2:
        G = min(G, max(1, B // 2))
    Bp = _round_up(B, G)
    if Bp != B:
        o3 = jnp.pad(o3, ((0, 0), (0, Bp - B), (0, 0)))
        t3 = jnp.pad(t3, ((0, 0), (0, Bp - B), (0, 0)))
    num_tiles = Bp // G
    Gp = G * Ppad

    o2 = o3.reshape(C, Bp * Ppad)
    t2 = t3.reshape(C, Bp * Ppad)

    # Valid-pixel mask: 1.0 at interior positions of each padded image.
    pos = jnp.arange(Ppad, dtype=jnp.int32)
    r_idx = pos // Wp
    c_idx = pos % Wp
    valid = (pos < P) & (r_idx >= 1) & (r_idx <= H) & (c_idx >= 1) & (c_idx <= W)
    mask = jnp.tile(valid.astype(jnp.float32), (Bp,)).reshape(1, Bp * Ppad)

    # conv weight (Cout, Cin, 3, 3) -> (9, Cout, Cin); bias -> (Cout, 1)
    w_taps = jnp.transpose(w_conv, (2, 3, 0, 1)).reshape(9, Cout, C).astype(jnp.float32)
    b_col = b_conv.reshape(Cout, 1).astype(jnp.float32)

    kernel = functools.partial(_combined_kernel, wp=Wp, gp=Gp)

    partials = pl.pallas_call(
        kernel,
        out_shape=jax.ShapeDtypeStruct((num_tiles, 2, 128), jnp.float32),
        grid_spec=pltpu.PrefetchScalarGridSpec(
            num_scalar_prefetch=0,
            grid=(num_tiles,),
            in_specs=[
                pl.BlockSpec((C, Gp), lambda i: (0, i)),
                pl.BlockSpec((C, Gp), lambda i: (0, i)),
                pl.BlockSpec((1, Gp), lambda i: (0, i)),
                # Constant block index -> weights/bias stay resident in VMEM.
                pl.BlockSpec((9, Cout, C), lambda i: (0, 0, 0)),
                pl.BlockSpec((Cout, 1), lambda i: (0, 0)),
            ],
            out_specs=pl.BlockSpec((1, 2, 128), lambda i: (i, 0, 0)),
        ),
        compiler_params=pltpu.CompilerParams(
            dimension_semantics=("parallel",),
        ),
    )(o2, t2, mask, w_taps, b_col)

    pix_ssd = jnp.sum(partials[:, 0, 0])
    feat_ssd = jnp.sum(partials[:, 1, 0])

    mse = pix_ssd / jnp.float32(B * C * H * W)
    perc = feat_ssd / jnp.float32(B * H * W * Cout)
    return alpha * mse + beta * perc


if __name__ == "__main__":
    key = jax.random.PRNGKey(0)
    k1, k2, k3, k4 = jax.random.split(key, 4)

    B, C, H, W = 2, 4, 16, 16
    C_FEAT = 8

    # Inputs (PyTorch NCHW layout)
    output = jax.random.normal(k1, (B, C, H, W), dtype=jnp.float32)
    target = jax.random.normal(k2, (B, C, H, W), dtype=jnp.float32)

    # Deterministic synthetic "perceptual" conv params (Conv2d(C, C_FEAT, 3, pad=1))
    w_conv = 0.1 * jax.random.normal(k3, (C_FEAT, C, 3, 3), dtype=jnp.float32)
    b_conv = 0.01 * jax.random.normal(k4, (C_FEAT,), dtype=jnp.float32)

    loss = combined_loss(output, target, w_conv, b_conv, alpha=1.0, beta=0.1)
    loss = jax.block_until_ready(loss)

    # Pure-JAX reference check
    ref_mse = jnp.mean((output - target) ** 2)

    def feat(x):
        xh = jnp.transpose(x, (0, 2, 3, 1))
        y = jax.lax.conv_general_dilated(
            xh, jnp.transpose(w_conv, (2, 3, 1, 0)),
            window_strides=(1, 1), padding="SAME",
            dimension_numbers=("NHWC", "HWIO", "NHWC"),
        ) + b_conv
        return jnp.maximum(y, 0.0)

    ref_perc = jnp.mean((feat(output) - feat(target)) ** 2)
    ref = 1.0 * ref_mse + 0.1 * ref_perc
    assert jnp.allclose(loss, ref, rtol=1e-4, atol=1e-5), (loss, ref)

    print("KERNEL_OK")
</pallas_src>

<mosaic_0001>
module attributes {stable_mosaic.version = 11 : i64} {
  func.func @_combined_kernel(%arg0: i32, %arg1: memref<4x384xf32, #tpu.memory_space<vmem>>, %arg2: memref<4x384xf32, #tpu.memory_space<vmem>>, %arg3: memref<1x384xf32, #tpu.memory_space<vmem>>, %arg4: memref<9x8x4xf32, #tpu.memory_space<vmem>>, %arg5: memref<8x1xf32, #tpu.memory_space<vmem>>, %arg6: memref<1x2x128xf32, #tpu.memory_space<vmem>>) attributes {dimension_semantics = [#tpu.dimension_semantics<parallel>], iteration_bounds = array<i64: 2>, scalar_prefetch = 0 : i64, scratch_operands = 0 : i64, tpu.core_type = #tpu.core_type<tc>, window_params = [{transform_indices = @transform_0, window_bounds = array<i64: 4, 384>}, {transform_indices = @transform_1, window_bounds = array<i64: 4, 384>}, {transform_indices = @transform_2, window_bounds = array<i64: 1, 384>}, {pipeline_mode = #tpu.pipeline_mode<synchronous>, transform_indices = @transform_3, window_bounds = array<i64: 9, 8, 4>}, {pipeline_mode = #tpu.pipeline_mode<synchronous>, transform_indices = @transform_4, window_bounds = array<i64: 8, 1>}, {transform_indices = @transform_5, window_bounds = array<i64: 1, 2, 128>}]} {
    %c0 = arith.constant 0 : index
    %c0_0 = arith.constant 0 : index
    %0 = vector.load %arg1[%c0, %c0_0] : memref<4x384xf32, #tpu.memory_space<vmem>>, vector<4x384xf32>
    %c0_1 = arith.constant 0 : index
    %c0_2 = arith.constant 0 : index
    %1 = vector.load %arg2[%c0_1, %c0_2] : memref<4x384xf32, #tpu.memory_space<vmem>>, vector<4x384xf32>
    %2 = arith.subf %0, %1 : vector<4x384xf32>
    %3 = arith.mulf %2, %2 : vector<4x384xf32>
    %4 = vector.shape_cast %3 : vector<4x384xf32> to vector<1x4x384xf32>
    %cst = arith.constant dense<0.000000e+00> : vector<1xf32>
    %5 = vector.multi_reduction <add>, %4, %cst [1, 2] : vector<1x4x384xf32> to vector<1xf32>
    %6 = vector.shape_cast %5 : vector<1xf32> to vector<1x1x1xf32>
    %7 = vector.extract %6[0, 0, 0] : f32 from vector<1x1x1xf32>
    %cst_3 = arith.constant 0.000000e+00 : f32
    %8 = vector.broadcast %cst_3 : f32 to vector<8x384xf32>
    %cst_4 = arith.constant 0.000000e+00 : f32
    %9 = vector.broadcast %cst_4 : f32 to vector<8x384xf32>
    %c0_5 = arith.constant 0 : index
    %c0_6 = arith.constant 0 : index
    %c0_7 = arith.constant 0 : index
    %10 = vector.load %arg4[%c0_5, %c0_6, %c0_7] : memref<9x8x4xf32, #tpu.memory_space<vmem>>, vector<1x8x4xf32>
    %11 = vector.shape_cast %10 : vector<1x8x4xf32> to vector<8x4xf32>
    %c19_i32 = arith.constant 19 : i32
    %12 = tpu.dynamic_rotate %0 by %c19_i32 dim 1 : vector<4x384xf32>, i32 -> vector<4x384xf32>
    %c19_i32_8 = arith.constant 19 : i32
    %13 = tpu.dynamic_rotate %1 by %c19_i32_8 dim 1 : vector<4x384xf32>, i32 -> vector<4x384xf32>
    %cst_9 = arith.constant dense<0.000000e+00> : vector<8x384xf32>
    %14 = tpu.matmul %11, %12, %cst_9 {dimension_numbers = #tpu.dot_dimension_numbers<[1], [0], [0], [1], [0, 0, 1, 1], [], []>} : vector<8x4xf32>, vector<4x384xf32>, vector<8x384xf32> -> vector<8x384xf32>
    %15 = arith.addf %8, %14 : vector<8x384xf32>
    %cst_10 = arith.constant dense<0.000000e+00> : vector<8x384xf32>
    %16 = tpu.matmul %11, %13, %cst_10 {dimension_numbers = #tpu.dot_dimension_numbers<[1], [0], [0], [1], [0, 0, 1, 1], [], []>} : vector<8x4xf32>, vector<4x384xf32>, vector<8x384xf32> -> vector<8x384xf32>
    %17 = arith.addf %9, %16 : vector<8x384xf32>
    %c1 = arith.constant 1 : index
    %c0_11 = arith.constant 0 : index
    %c0_12 = arith.constant 0 : index
    %18 = vector.load %arg4[%c1, %c0_11, %c0_12] : memref<9x8x4xf32, #tpu.memory_space<vmem>>, vector<1x8x4xf32>
    %19 = vector.shape_cast %18 : vector<1x8x4xf32> to vector<8x4xf32>
    %c18_i32 = arith.constant 18 : i32
    %20 = tpu.dynamic_rotate %0 by %c18_i32 dim 1 : vector<4x384xf32>, i32 -> vector<4x384xf32>
    %c18_i32_13 = arith.constant 18 : i32
    %21 = tpu.dynamic_rotate %1 by %c18_i32_13 dim 1 : vector<4x384xf32>, i32 -> vector<4x384xf32>
    %cst_14 = arith.constant dense<0.000000e+00> : vector<8x384xf32>
    %22 = tpu.matmul %19, %20, %cst_14 {dimension_numbers = #tpu.dot_dimension_numbers<[1], [0], [0], [1], [0, 0, 1, 1], [], []>} : vector<8x4xf32>, vector<4x384xf32>, vector<8x384xf32> -> vector<8x384xf32>
    %23 = arith.addf %15, %22 : vector<8x384xf32>
    %cst_15 = arith.constant dense<0.000000e+00> : vector<8x384xf32>
    %24 = tpu.matmul %19, %21, %cst_15 {dimension_numbers = #tpu.dot_dimension_numbers<[1], [0], [0], [1], [0, 0, 1, 1], [], []>} : vector<8x4xf32>, vector<4x384xf32>, vector<8x384xf32> -> vector<8x384xf32>
    %25 = arith.addf %17, %24 : vector<8x384xf32>
    %c2 = arith.constant 2 : index
    %c0_16 = arith.constant 0 : index
    %c0_17 = arith.constant 0 : index
    %26 = vector.load %arg4[%c2, %c0_16, %c0_17] : memref<9x8x4xf32, #tpu.memory_space<vmem>>, vector<1x8x4xf32>
    %27 = vector.shape_cast %26 : vector<1x8x4xf32> to vector<8x4xf32>
    %c17_i32 = arith.constant 17 : i32
    %28 = tpu.dynamic_rotate %0 by %c17_i32 dim 1 : vector<4x384xf32>, i32 -> vector<4x384xf32>
    %c17_i32_18 = arith.constant 17 : i32
    %29 = tpu.dynamic_rotate %1 by %c17_i32_18 dim 1 : vector<4x384xf32>, i32 -> vector<4x384xf32>
    %cst_19 = arith.constant dense<0.000000e+00> : vector<8x384xf32>
    %30 = tpu.matmul %27, %28, %cst_19 {dimension_numbers = #tpu.dot_dimension_numbers<[1], [0], [0], [1], [0, 0, 1, 1], [], []>} : vector<8x4xf32>, vector<4x384xf32>, vector<8x384xf32> -> vector<8x384xf32>
    %31 = arith.addf %23, %30 : vector<8x384xf32>
    %cst_20 = arith.constant dense<0.000000e+00> : vector<8x384xf32>
    %32 = tpu.matmul %27, %29, %cst_20 {dimension_numbers = #tpu.dot_dimension_numbers<[1], [0], [0], [1], [0, 0, 1, 1], [], []>} : vector<8x4xf32>, vector<4x384xf32>, vector<8x384xf32> -> vector<8x384xf32>
    %33 = arith.addf %25, %32 : vector<8x384xf32>
    %c3 = arith.constant 3 : index
    %c0_21 = arith.constant 0 : index
    %c0_22 = arith.constant 0 : index
    %34 = vector.load %arg4[%c3, %c0_21, %c0_22] : memref<9x8x4xf32, #tpu.memory_space<vmem>>, vector<1x8x4xf32>
    %35 = vector.shape_cast %34 : vector<1x8x4xf32> to vector<8x4xf32>
    %c1_i32 = arith.constant 1 : i32
    %36 = tpu.dynamic_rotate %0 by %c1_i32 dim 1 : vector<4x384xf32>, i32 -> vector<4x384xf32>
    %c1_i32_23 = arith.constant 1 : i32
    %37 = tpu.dynamic_rotate %1 by %c1_i32_23 dim 1 : vector<4x384xf32>, i32 -> vector<4x384xf32>
    %cst_24 = arith.constant dense<0.000000e+00> : vector<8x384xf32>
    %38 = tpu.matmul %35, %36, %cst_24 {dimension_numbers = #tpu.dot_dimension_numbers<[1], [0], [0], [1], [0, 0, 1, 1], [], []>} : vector<8x4xf32>, vector<4x384xf32>, vector<8x384xf32> -> vector<8x384xf32>
    %39 = arith.addf %31, %38 : vector<8x384xf32>
    %cst_25 = arith.constant dense<0.000000e+00> : vector<8x384xf32>
    %40 = tpu.matmul %35, %37, %cst_25 {dimension_numbers = #tpu.dot_dimension_numbers<[1], [0], [0], [1], [0, 0, 1, 1], [], []>} : vector<8x4xf32>, vector<4x384xf32>, vector<8x384xf32> -> vector<8x384xf32>
    %41 = arith.addf %33, %40 : vector<8x384xf32>
    %c4 = arith.constant 4 : index
    %c0_26 = arith.constant 0 : index
    %c0_27 = arith.constant 0 : index
    %42 = vector.load %arg4[%c4, %c0_26, %c0_27] : memref<9x8x4xf32, #tpu.memory_space<vmem>>, vector<1x8x4xf32>
    %43 = vector.shape_cast %42 : vector<1x8x4xf32> to vector<8x4xf32>
    %cst_28 = arith.constant dense<0.000000e+00> : vector<8x384xf32>
    %44 = tpu.matmul %43, %0, %cst_28 {dimension_numbers = #tpu.dot_dimension_numbers<[1], [0], [0], [1], [0, 0, 1, 1], [], []>} : vector<8x4xf32>, vector<4x384xf32>, vector<8x384xf32> -> vector<8x384xf32>
    %45 = arith.addf %39, %44 : vector<8x384xf32>
    %cst_29 = arith.constant dense<0.000000e+00> : vector<8x384xf32>
    %46 = tpu.matmul %43, %1, %cst_29 {dimension_numbers = #tpu.dot_dimension_numbers<[1], [0], [0], [1], [0, 0, 1, 1], [], []>} : vector<8x4xf32>, vector<4x384xf32>, vector<8x384xf32> -> vector<8x384xf32>
    %47 = arith.addf %41, %46 : vector<8x384xf32>
    %c5 = arith.constant 5 : index
    %c0_30 = arith.constant 0 : index
    %c0_31 = arith.constant 0 : index
    %48 = vector.load %arg4[%c5, %c0_30, %c0_31] : memref<9x8x4xf32, #tpu.memory_space<vmem>>, vector<1x8x4xf32>
    %49 = vector.shape_cast %48 : vector<1x8x4xf32> to vector<8x4xf32>
    %c383_i32 = arith.constant 383 : i32
    %50 = tpu.dynamic_rotate %0 by %c383_i32 dim 1 : vector<4x384xf32>, i32 -> vector<4x384xf32>
    %c383_i32_32 = arith.constant 383 : i32
    %51 = tpu.dynamic_rotate %1 by %c383_i32_32 dim 1 : vector<4x384xf32>, i32 -> vector<4x384xf32>
    %cst_33 = arith.constant dense<0.000000e+00> : vector<8x384xf32>
    %52 = tpu.matmul %49, %50, %cst_33 {dimension_numbers = #tpu.dot_dimension_numbers<[1], [0], [0], [1], [0, 0, 1, 1], [], []>} : vector<8x4xf32>, vector<4x384xf32>, vector<8x384xf32> -> vector<8x384xf32>
    %53 = arith.addf %45, %52 : vector<8x384xf32>
    %cst_34 = arith.constant dense<0.000000e+00> : vector<8x384xf32>
    %54 = tpu.matmul %49, %51, %cst_34 {dimension_numbers = #tpu.dot_dimension_numbers<[1], [0], [0], [1], [0, 0, 1, 1], [], []>} : vector<8x4xf32>, vector<4x384xf32>, vector<8x384xf32> -> vector<8x384xf32>
    %55 = arith.addf %47, %54 : vector<8x384xf32>
    %c6 = arith.constant 6 : index
    %c0_35 = arith.constant 0 : index
    %c0_36 = arith.constant 0 : index
    %56 = vector.load %arg4[%c6, %c0_35, %c0_36] : memref<9x8x4xf32, #tpu.memory_space<vmem>>, vector<1x8x4xf32>
    %57 = vector.shape_cast %56 : vector<1x8x4xf32> to vector<8x4xf32>
    %c367_i32 = arith.constant 367 : i32
    %58 = tpu.dynamic_rotate %0 by %c367_i32 dim 1 : vector<4x384xf32>, i32 -> vector<4x384xf32>
    %c367_i32_37 = arith.constant 367 : i32
    %59 = tpu.dynamic_rotate %1 by %c367_i32_37 dim 1 : vector<4x384xf32>, i32 -> vector<4x384xf32>
    %cst_38 = arith.constant dense<0.000000e+00> : vector<8x384xf32>
    %60 = tpu.matmul %57, %58, %cst_38 {dimension_numbers = #tpu.dot_dimension_numbers<[1], [0], [0], [1], [0, 0, 1, 1], [], []>} : vector<8x4xf32>, vector<4x384xf32>, vector<8x384xf32> -> vector<8x384xf32>
    %61 = arith.addf %53, %60 : vector<8x384xf32>
    %cst_39 = arith.constant dense<0.000000e+00> : vector<8x384xf32>
    %62 = tpu.matmul %57, %59, %cst_39 {dimension_numbers = #tpu.dot_dimension_numbers<[1], [0], [0], [1], [0, 0, 1, 1], [], []>} : vector<8x4xf32>, vector<4x384xf32>, vector<8x384xf32> -> vector<8x384xf32>
    %63 = arith.addf %55, %62 : vector<8x384xf32>
    %c7 = arith.constant 7 : index
    %c0_40 = arith.constant 0 : index
    %c0_41 = arith.constant 0 : index
    %64 = vector.load %arg4[%c7, %c0_40, %c0_41] : memref<9x8x4xf32, #tpu.memory_space<vmem>>, vector<1x8x4xf32>
    %65 = vector.shape_cast %64 : vector<1x8x4xf32> to vector<8x4xf32>
    %c366_i32 = arith.constant 366 : i32
    %66 = tpu.dynamic_rotate %0 by %c366_i32 dim 1 : vector<4x384xf32>, i32 -> vector<4x384xf32>
    %c366_i32_42 = arith.constant 366 : i32
    %67 = tpu.dynamic_rotate %1 by %c366_i32_42 dim 1 : vector<4x384xf32>, i32 -> vector<4x384xf32>
    %cst_43 = arith.constant dense<0.000000e+00> : vector<8x384xf32>
    %68 = tpu.matmul %65, %66, %cst_43 {dimension_numbers = #tpu.dot_dimension_numbers<[1], [0], [0], [1], [0, 0, 1, 1], [], []>} : vector<8x4xf32>, vector<4x384xf32>, vector<8x384xf32> -> vector<8x384xf32>
    %69 = arith.addf %61, %68 : vector<8x384xf32>
    %cst_44 = arith.constant dense<0.000000e+00> : vector<8x384xf32>
    %70 = tpu.matmul %65, %67, %cst_44 {dimension_numbers = #tpu.dot_dimension_numbers<[1], [0], [0], [1], [0, 0, 1, 1], [], []>} : vector<8x4xf32>, vector<4x384xf32>, vector<8x384xf32> -> vector<8x384xf32>
    %71 = arith.addf %63, %70 : vector<8x384xf32>
    %c8 = arith.constant 8 : index
    %c0_45 = arith.constant 0 : index
    %c0_46 = arith.constant 0 : index
    %72 = vector.load %arg4[%c8, %c0_45, %c0_46] : memref<9x8x4xf32, #tpu.memory_space<vmem>>, vector<1x8x4xf32>
    %73 = vector.shape_cast %72 : vector<1x8x4xf32> to vector<8x4xf32>
    %c365_i32 = arith.constant 365 : i32
    %74 = tpu.dynamic_rotate %0 by %c365_i32 dim 1 : vector<4x384xf32>, i32 -> vector<4x384xf32>
    %c365_i32_47 = arith.constant 365 : i32
    %75 = tpu.dynamic_rotate %1 by %c365_i32_47 dim 1 : vector<4x384xf32>, i32 -> vector<4x384xf32>
    %cst_48 = arith.constant dense<0.000000e+00> : vector<8x384xf32>
    %76 = tpu.matmul %73, %74, %cst_48 {dimension_numbers = #tpu.dot_dimension_numbers<[1], [0], [0], [1], [0, 0, 1, 1], [], []>} : vector<8x4xf32>, vector<4x384xf32>, vector<8x384xf32> -> vector<8x384xf32>
    %77 = arith.addf %69, %76 : vector<8x384xf32>
    %cst_49 = arith.constant dense<0.000000e+00> : vector<8x384xf32>
    %78 = tpu.matmul %73, %75, %cst_49 {dimension_numbers = #tpu.dot_dimension_numbers<[1], [0], [0], [1], [0, 0, 1, 1], [], []>} : vector<8x4xf32>, vector<4x384xf32>, vector<8x384xf32> -> vector<8x384xf32>
    %79 = arith.addf %71, %78 : vector<8x384xf32>
    %c0_50 = arith.constant 0 : index
    %c0_51 = arith.constant 0 : index
    %80 = vector.load %arg5[%c0_50, %c0_51] : memref<8x1xf32, #tpu.memory_space<vmem>>, vector<8x1xf32>
    %81 = vector.broadcast %80 : vector<8x1xf32> to vector<8x384xf32>
    %82 = arith.addf %77, %81 : vector<8x384xf32>
    %cst_52 = arith.constant 0.000000e+00 : f32
    %83 = vector.broadcast %cst_52 : f32 to vector<8x384xf32>
    %84 = arith.maximumf %82, %83 : vector<8x384xf32>
    %85 = vector.broadcast %80 : vector<8x1xf32> to vector<8x384xf32>
    %86 = arith.addf %79, %85 : vector<8x384xf32>
    %cst_53 = arith.constant 0.000000e+00 : f32
    %87 = vector.broadcast %cst_53 : f32 to vector<8x384xf32>
    %88 = arith.maximumf %86, %87 : vector<8x384xf32>
    %89 = arith.subf %84, %88 : vector<8x384xf32>
    %90 = arith.mulf %89, %89 : vector<8x384xf32>
    %c0_54 = arith.constant 0 : index
    %c0_55 = arith.constant 0 : index
    %91 = vector.load %arg3[%c0_54, %c0_55] : memref<1x384xf32, #tpu.memory_space<vmem>>, vector<1x384xf32>
    %92 = vector.broadcast %91 : vector<1x384xf32> to vector<8x384xf32>
    %93 = arith.mulf %90, %92 : vector<8x384xf32>
    %94 = vector.shape_cast %93 : vector<8x384xf32> to vector<1x8x384xf32>
    %cst_56 = arith.constant dense<0.000000e+00> : vector<1xf32>
    %95 = vector.multi_reduction <add>, %94, %cst_56 [1, 2] : vector<1x8x384xf32> to vector<1xf32>
    %96 = vector.shape_cast %95 : vector<1xf32> to vector<1x1x1xf32>
    %97 = vector.extract %96[0, 0, 0] : f32 from vector<1x1x1xf32>
    %98 = tpu.iota {dimensions = array<i32: 1>} : vector<1x2x128xi32>
    %c0_i32 = arith.constant 0 : i32
    %99 = vector.broadcast %c0_i32 : i32 to vector<1x2x128xi32>
    %100 = arith.cmpi eq, %98, %99 : vector<1x2x128xi32>
    %101 = vector.broadcast %7 : f32 to vector<1x2x128xf32>
    %102 = vector.broadcast %97 : f32 to vector<1x2x128xf32>
    %103 = arith.select %100, %101, %102 : vector<1x2x128xi1>, vector<1x2x128xf32>
    %c0_57 = arith.constant 0 : index
    %c0_58 = arith.constant 0 : index
    %c0_59 = arith.constant 0 : index
    %104 = vector.load %arg6[%c0_57, %c0_58, %c0_59] : memref<1x2x128xf32, #tpu.memory_space<vmem>>, vector<1x2x128xf32>
    tpu.vector_store %arg6[%c0_57, %c0_58, %c0_59], %103 {strides = array<i32>} : memref<1x2x128xf32, #tpu.memory_space<vmem>>, vector<1x2x128xf32>,
    return
  }
  func.func @transform_0(%arg0: i32) -> (i32, i32) {
    %c0_i32 = arith.constant 0 : i32
    %c0_i32_0 = arith.constant 0 : i32
    return %c0_i32, %arg0 : i32, i32
  }
  func.func @transform_1(%arg0: i32) -> (i32, i32) {
    %c0_i32 = arith.constant 0 : i32
    %c0_i32_0 = arith.constant 0 : i32
    return %c0_i32, %arg0 : i32, i32
  }
  func.func @transform_2(%arg0: i32) -> (i32, i32) {
    %c0_i32 = arith.constant 0 : i32
    %c0_i32_0 = arith.constant 0 : i32
    return %c0_i32, %arg0 : i32, i32
  }
  func.func @transform_3(%arg0: i32) -> (i32, i32, i32) {
    %c0_i32 = arith.constant 0 : i32
    %c0_i32_0 = arith.constant 0 : i32
    %c0_i32_1 = arith.constant 0 : i32
    %c0_i32_2 = arith.constant 0 : i32
    return %c0_i32, %c0_i32_0, %c0_i32_1 : i32, i32, i32
  }
  func.func @transform_4(%arg0: i32) -> (i32, i32) {
    %c0_i32 = arith.constant 0 : i32
    %c0_i32_0 = arith.constant 0 : i32
    %c0_i32_1 = arith.constant 0 : i32
    return %c0_i32, %c0_i32_0 : i32, i32
  }
  func.func @transform_5(%arg0: i32) -> (i32, i32, i32) {
    %c0_i32 = arith.constant 0 : i32
    %c0_i32_0 = arith.constant 0 : i32
    %c0_i32_1 = arith.constant 0 : i32
    return %arg0, %c0_i32, %c0_i32_0 : i32, i32, i32
  }
}

</mosaic_0001>

<bundles_post_ra>
// kernel: combined_loss.1
= control target key start
LH: loop header
LB: loop body
LE: loop exit
PB: predicated region body
PF: predicated region fallthrough
CT: control target
= control target key end

     0   :  { %s3712_s18 = smov 0   ;;  %s4127_s0 = inlined_call_operand.vmem [shape: f32[4,768], index: 0, kind: input, shape index: {}]   ;;  %s4128_s1 = inlined_call_operand.vmem [shape: f32[4,768], index: 1, kind: input, shape index: {}]   ;;  %s4129_s2 = inlined_call_operand.vmem [shape: f32[1,768], index: 2, kind: input, shape index: {}]   ;;  %s4130_s3 = inlined_call_operand.vmem [shape: f32[9,8,4], index: 3, kind: input, shape index: {}]   ;;  %s4131_s4 = inlined_call_operand.vmem [shape: f32[8,1], index: 4, kind: input, shape index: {}]   ;;  %s4132_s5 = inlined_call_operand.vmem [shape: f32[2,2,128], index: 5, kind: output, shape index: {}]  }
   0x1 LB: > { %s3718_s19 = sadd.s32 4294967295, %s3669_s18   ;;  %p3375_p0 = scmp.ge.s32.totalorder %s3669_s18, 1  ;;  %s3669_s18 = sphi %s3712_s18, %s15_s18  }
   0x2   : > { %p209_p1 = scmp.lt.s32.totalorder %s3669_s18, 3 }
   0x4   : > { %p210_p2 = pnand %p3375_p0, %p209_p1 }
   0x5   : > { %s245_s20 = smul.u32 (!%p210_p2), 3, %s3718_s19  ;;  %v3671_v0 = vmov (!%p210_p2), 0.0   ;;  %vm3672_vm0 = vmmov (!%p210_p2), 0   ;;  %s3673_s25 = smov (!%p210_p2), 18   ;;  %v3680_v7 = vmov (!%p210_p2), 0   ;;  %v3235_v8 = vld [vmem:[%s4131_s4] sm:$0xff] (!%p210_p2)  ;;  %v303_v9 = vlaneseq (!%p210_p2) }
   0x6   : > { %213 = sbr.rel (%p210_p2) target bundleno = 661 (0x295), region = 40  ;;  %3515 = vmatprep.subr.mxu1 (!%p210_p2), %v3671_v0  ;;  %420 = vmatprep.mubr.f32.mxu0 (!%p210_p2), %v3671_v0  ;;  %s3674_s29 = smov (!%p210_p2), 19   ;;  %vm277_vm1 = vcmask (!%p210_p2), 1043456   ;;  %v3379_v17 = vld [vmem:[%s4130_s3 + $0x8] sm:$0xff] (!%p210_p2)  ;;  %vm343_vm3 = vcmask (!%p210_p2), 31744   ;;  %v292_v24 = vld [vmem:[%s4130_s3] sm:$0xff] (!%p210_p2) }
   0x7   : > { %p246_p3 = scmp.lt.s32.totalorder (!%p210_p2), %s245_s20, 5  ;;  %3517 = vmatprep.mubr.msk.f32.mxu1 (!%p210_p2), %vm3672_vm0, %v3671_v0  ;;  %s3675_s30 = smov (!%p210_p2), 17   ;;  %3660 = vset.pattern.permute.xlu0 (!%p210_p2), %v3680_v7  ;;  %v3804_v10 = vand.u32 (!%p210_p2), 127, %v303_v9  ;;  %v3400_v42 = vld [vmem:[%s4130_s3 + $0x10] sm:$0xff] (!%p210_p2)  ;;  %v3411_v55 = vld [vmem:[%s4130_s3 + $0x18] sm:$0xff] (!%p210_p2) }
   0x8   : > { %s3676_s6 = smov (!%p210_p2), 1   ;;  %s3677_s7 = smov (!%p210_p2), 127  }
   0x9   : > { %s3678_s8 = smov (!%p210_p2), 111   ;;  %s3679_s9 = smov (!%p210_p2), 110   ;;  %vm330_vm2 = vcmp.lt.s32.totalorder (!%p210_p2), %v3804_v10, 18  ;;  %vm305_vm4 = vcmp.lt.s32.totalorder (!%p210_p2), %v3804_v10, 19  ;;  %vm958_vm5 = vcmp.lt.s32.totalorder (!%p210_p2), %v3804_v10, 17  ;;  %vm1288_vm6 = vcmp.lt.s32.totalorder (!%p210_p2), %v3804_v10, 1 }
   0xa   : > { %s3681_s10 = smov (!%p210_p2), 109   ;;  %vm1923_vm7 = vcmp.lt.s32.totalorder (!%p210_p2), %v3804_v10, 127  ;;  %vm2253_vm8 = vcmp.lt.s32.totalorder (!%p210_p2), %v3804_v10, 111  ;;  %vm2583_vm9 = vcmp.lt.s32.totalorder (!%p210_p2), %v3804_v10, 110  ;;  %vm2913_vm10 = vcmp.lt.s32.totalorder (!%p210_p2), %v3804_v10, 109  ;;  %p262_p4 = scmp.lt.s32.totalorder (!%p210_p2), %s3718_s19, 1 }
   0xd   : > { %s4134_s20 = smov (!%p246_p3, %s245_s20), 5  ;;  %s4136_s19 = smov (!%p262_p4, %s3718_s19), 1 }
   0xe   : > { %s3376_s21 = sshll.u32 %s4134_s20, 2  ;;  %s260_s11 = scalar_lea.vmem %s4129_s2, %s4134_s20 }
   0xf   : > { %s249_s24 = scalar_lea.vmem %s4127_s0, %s3376_s21  ;;  %s255_s28 = scalar_lea.vmem %s4128_s1, %s3376_s21 }
  0x10   : > { %v3733_v1 = vld [vmem:[%s249_s24 + $0x8] sm:$0xf]  ;;  %v3735_v2 = vld [vmem:[%s249_s24] sm:$0xff]  ;;  %s3378_s20 = sshll.u32 %s4136_s19, 1 }
  0x11   : > { %328 = vrot.lane.b32.xlu1 %v3733_v1, %s3673_s25  ;;  %324 = vrot.lane.b32.xlu0 %v3735_v2, %s3673_s25  ;;  %v3741_v3 = vcombine.high %v3735_v2, %v3735_v2  ;;  %v3748_v4 = vld [vmem:[%s255_s28] sm:$0xff]  ;;  %v3758_v6 = vld [vmem:[%s255_s28 + $0x8] sm:$0xf]  ;;  %s265_s15 = scalar_lea.vmem %s4132_s5, %s3378_s20 }
  0x12   : > { %v3754_v5 = vcombine.high %v3748_v4, %v3748_v4  ;;  %v271_v10 = vsub.f32 %v3733_v1, %v3758_v6 }
  0x15   : > { %297 = vrot.lane.b32.xlu1 %v3735_v2, %s3674_s29  ;;  %326 = vrot.lane.b32.xlu0 %v3741_v3, %s3673_s25 }
  0x19   : > { %301 = vrot.lane.b32.xlu1 %v3733_v1, %s3674_s29  ;;  %299 = vrot.lane.b32.xlu0 %v3741_v3, %s3674_s29 }
  0x1d   : > { %336 = vrot.lane.b32.xlu1 %v3754_v5, %s3673_s25  ;;  %334 = vrot.lane.b32.xlu0 %v3748_v4, %s3673_s25 }
  0x21   : > { %313 = vrot.lane.b32.xlu1 %v3748_v4, %s3674_s29  ;;  %338 = vrot.lane.b32.xlu0 %v3758_v6, %s3673_s25 }
  0x25   : > { %317 = vrot.lane.b32.xlu1 %v3758_v6, %s3674_s29  ;;  %315 = vrot.lane.b32.xlu0 %v3754_v5, %s3674_s29 }
  0x29   : > { %954 = vrot.lane.b32.xlu1 %v3741_v3, %s3675_s30  ;;  %952 = vrot.lane.b32.xlu0 %v3735_v2, %s3675_s30 }
  0x2d   : > { %962 = vrot.lane.b32.xlu1 %v3748_v4, %s3675_s30  ;;  %956 = vrot.lane.b32.xlu0 %v3733_v1, %s3675_s30 }
  0x31   : > { %966 = vrot.lane.b32.xlu1 %v3758_v6, %s3675_s30  ;;  %964 = vrot.lane.b32.xlu0 %v3754_v5, %s3675_s30 }
  0x35   : > { %1284 = vrot.lane.b32.xlu1 %v3741_v3, %s3676_s6  ;;  %1282 = vrot.lane.b32.xlu0 %v3735_v2, %s3676_s6 }
  0x39   : > { %1292 = vrot.lane.b32.xlu1 %v3748_v4, %s3676_s6  ;;  %1286 = vrot.lane.b32.xlu0 %v3733_v1, %s3676_s6 }
  0x3d   : > { %1296 = vrot.lane.b32.xlu1 %v3758_v6, %s3676_s6  ;;  %1294 = vrot.lane.b32.xlu0 %v3754_v5, %s3676_s6 }
  0x41   : > { %1921 = vrot.lane.b32.xlu1 %v3733_v1, %s3677_s7  ;;  %1919 = vrot.lane.b32.xlu0 %v3741_v3, %s3677_s7 }
  0x45   : > { %1929 = vrot.lane.b32.xlu1 %v3754_v5, %s3677_s7  ;;  %1917 = vrot.lane.b32.xlu0 %v3735_v2, %s3677_s7 }
  0x49   : > { %1927 = vrot.lane.b32.xlu1 %v3748_v4, %s3677_s7  ;;  %1931 = vrot.lane.b32.xlu0 %v3758_v6, %s3677_s7 }
  0x4d   : > { %2251 = vrot.lane.b32.xlu1 %v3733_v1, %s3678_s8  ;;  %2249 = vrot.lane.b32.xlu0 %v3741_v3, %s3678_s8 }
  0x51   : > { %2259 = vrot.lane.b32.xlu1 %v3754_v5, %s3678_s8  ;;  %2247 = vrot.lane.b32.xlu0 %v3735_v2, %s3678_s8 }
  0x55   : > { %2257 = vrot.lane.b32.xlu1 %v3748_v4, %s3678_s8  ;;  %2261 = vrot.lane.b32.xlu0 %v3758_v6, %s3678_s8 }
  0x59   : > { %2581 = vrot.lane.b32.xlu1 %v3733_v1, %s3679_s9  ;;  %2579 = vrot.lane.b32.xlu0 %v3741_v3, %s3679_s9 }
  0x5d   : > { %2589 = vrot.lane.b32.xlu1 %v3754_v5, %s3679_s9  ;;  %2577 = vrot.lane.b32.xlu0 %v3735_v2, %s3679_s9 }
  0x61   : > { %2587 = vrot.lane.b32.xlu1 %v3748_v4, %s3679_s9  ;;  %2591 = vrot.lane.b32.xlu0 %v3758_v6, %s3679_s9 }
  0x65   : > { %2911 = vrot.lane.b32.xlu1 %v3733_v1, %s3681_s10  ;;  %2909 = vrot.lane.b32.xlu0 %v3741_v3, %s3681_s10 }
  0x69   : > { %2919 = vrot.lane.b32.xlu1 %v3754_v5, %s3681_s10  ;;  %2907 = vrot.lane.b32.xlu0 %v3735_v2, %s3681_s10 }
  0x6d   : > { %2917 = vrot.lane.b32.xlu1 %v3748_v4, %s3681_s10  ;;  %2921 = vrot.lane.b32.xlu0 %v3758_v6, %s3681_s10 }
  0x71   : > { %3238 = vperm.xlu0 %3660, %v3235_v8   ;;  %v3422_v8 = vld [vmem:[%s4130_s3 + $0x20] sm:$0xff] }
  0x83   : > { %v329_v11 = vpop.permute.xlu1 %328  ;;  %v325_v12 = vpop.permute.xlu0 %324 }
  0x84   : > { %v333_v18 = vsel %vm330_vm2, %v329_v11, %v325_v12 }
  0x87   : > { %v298_v13 = vpop.permute.xlu1 %297  ;;  %v327_v14 = vpop.permute.xlu0 %326 }
  0x88   : > { %v332_v15 = vsel %vm330_vm2, %v325_v12, %v327_v14  ;;  %v331_v16 = vsel %vm330_vm2, %v327_v14, %v329_v11 }
  0x89   : > { %3380 = vmatprep.subr.msk.mxu0 %vm277_vm1, %v332_v15  ;;  %3516 = vmatpush3.msk.msra.mxu1 %vm277_vm1, %v331_v16 }
  0x8a   : > { %3381 = vmatpush1.msk.msra.mxu0 %vm277_vm1, %v333_v18  ;;  %3520 = vmatprep.subr.mxu1 %v3671_v0 }
  0x8b   : > { %v302_v19 = vpop.permute.xlu1 %301  ;;  %v300_v20 = vpop.permute.xlu0 %299  ;;  %3382 = vmatmul.mubr.msk.f32.vlgmr.msra.gmra.mrb[0].mxu0 %vm343_vm3, %v3379_v17  ;;  %3518 = vmatmul.mubr.msk.f32.vlgmr.msra.gmra.mrb[0].mxu1 %vm343_vm3, %v3379_v17 }
  0x8c   : > { %v308_v21 = vsel %vm305_vm4, %v302_v19, %v298_v13  ;;  %v306_v22 = vsel %vm305_vm4, %v300_v20, %v302_v19  ;;  %v307_v23 = vsel %vm305_vm4, %v298_v13, %v300_v20  ;;  %573 = vmatprep.mubr.f32.mxu0 %v3671_v0  ;;  %3522 = vmatprep.mubr.msk.f32.mxu1 %vm3672_vm0, %v3671_v0 }
  0x8d   : > { %3385 = vmatprep.subr.msk.mxu0 %vm277_vm1, %v307_v23  ;;  %3521 = vmatpush3.msk.msra.mxu1 %vm277_vm1, %v306_v22 }
  0x8e   : > { %3386 = vmatpush1.msk.msra.mxu0 %vm277_vm1, %v308_v21  ;;  %3525 = vmatprep.subr.mxu1 %v3671_v0 }
  0x8f   : > { %v337_v25 = vpop.permute.xlu1 %336  ;;  %v335_v26 = vpop.permute.xlu0 %334  ;;  %3523 = vmatmul.mubr.msk.f32.vlgmr.msra.gmra.mrb[2].mxu1 %vm343_vm3, %v292_v24 }
  0x90   : > { %v341_v27 = vsel %vm330_vm2, %v335_v26, %v337_v25  ;;  %3527 = vmatprep.mubr.msk.f32.mxu1 %vm3672_vm0, %v3671_v0 }
  0x91   : > { %3390 = vmatprep.subr.msk.mxu0 %vm277_vm1, %v341_v27  ;;  %v3444_v27 = vld [vmem:[%s4130_s3 + $0x30] sm:$0xff] }
  0x93   : > { %v314_v28 = vpop.permute.xlu1 %313  ;;  %v339_v29 = vpop.permute.xlu0 %338  ;;  %3387 = vmatmul.mubr.msk.f32.vlgmr.msra.gmra.mrb[0].mxu0 %vm343_vm3, %v292_v24 }
  0x94   : > { %v340_v30 = vsel %vm330_vm2, %v337_v25, %v339_v29  ;;  %v342_v31 = vsel %vm330_vm2, %v339_v29, %v335_v26  ;;  %723 = vmatprep.mubr.f32.mxu0 %v3671_v0 }
  0x95   : > { %3391 = vmatpush1.msk.msra.mxu0 %vm277_vm1, %v342_v31  ;;  %3526 = vmatpush3.msk.msra.mxu1 %vm277_vm1, %v340_v30 }
  0x96   : > { %3530 = vmatprep.subr.mxu1 %v3671_v0  ;;  %3528 = vmatmul.mubr.msk.f32.vlgmr.msra.gmra.mrb[4].mxu1 %vm343_vm3, %v3379_v17 }
  0x97   : > { %v318_v32 = vpop.permute.xlu1 %317  ;;  %v316_v33 = vpop.permute.xlu0 %315  ;;  %3392 = vmatmul.mubr.msk.f32.vlgmr.msra.gmra.mrb[2].mxu0 %vm343_vm3, %v3379_v17  ;;  %3532 = vmatprep.mubr.msk.f32.mxu1 %vm3672_vm0, %v3671_v0  ;;  %v3433_v17 = vld [vmem:[%s4130_s3 + $0x28] sm:$0xff] }
  0x98   : > { %v321_v34 = vsel %vm305_vm4, %v318_v32, %v314_v28  ;;  %v319_v35 = vsel %vm305_vm4, %v316_v33, %v318_v32  ;;  %v320_v36 = vsel %vm305_vm4, %v314_v28, %v316_v33  ;;  %873 = vmatprep.mubr.f32.mxu0 %v3671_v0 }
  0x99   : > { %3395 = vmatprep.subr.msk.mxu0 %vm277_vm1, %v320_v36  ;;  %3531 = vmatpush3.msk.msra.mxu1 %vm277_vm1, %v319_v35 }
  0x9a   : > { %3396 = vmatpush1.msk.msra.mxu0 %vm277_vm1, %v321_v34  ;;  %3535 = vmatprep.subr.mxu1 %v3671_v0 }
  0x9b   : > { %v955_v37 = vpop.permute.xlu1 %954  ;;  %v953_v38 = vpop.permute.xlu0 %952  ;;  %3533 = vmatmul.mubr.msk.f32.vlgmr.msra.gmra.mrb[6].mxu1 %vm343_vm3, %v292_v24 }
  0x9c   : > { %v960_v39 = vsel %vm958_vm5, %v953_v38, %v955_v37  ;;  %3537 = vmatprep.mubr.msk.f32.mxu1 %vm3672_vm0, %v3671_v0 }
  0x9d   : > { %3401 = vmatprep.subr.msk.mxu0 %vm277_vm1, %v960_v39 }
  0x9f   : > { %v963_v40 = vpop.permute.xlu1 %962  ;;  %v957_v41 = vpop.permute.xlu0 %956  ;;  %3397 = vmatmul.mubr.msk.f32.vlgmr.msra.gmra.mrb[2].mxu0 %vm343_vm3, %v292_v24 }
  0xa0   : > { %v959_v43 = vsel %vm958_vm5, %v955_v37, %v957_v41  ;;  %v961_v44 = vsel %vm958_vm5, %v957_v41, %v953_v38  ;;  %1047 = vmatprep.mubr.f32.mxu0 %v3671_v0  ;;  %v3455_v38 = vld [vmem:[%s4130_s3 + $0x38] sm:$0xff] }
  0xa1   : > { %3402 = vmatpush1.msk.msra.mxu0 %vm277_vm1, %v961_v44  ;;  %3536 = vmatpush3.msk.msra.mxu1 %vm277_vm1, %v959_v43 }
  0xa2   : > { %3540 = vmatprep.subr.mxu1 %v3671_v0  ;;  %3538 = vmatmul.mubr.msk.f32.vlgmr.msra.gmra.mrb[8].mxu1 %vm343_vm3, %v3400_v42 }
  0xa3   : > { %v967_v45 = vpop.permute.xlu1 %966  ;;  %v965_v46 = vpop.permute.xlu0 %964  ;;  %3403 = vmatmul.mubr.msk.f32.vlgmr.msra.gmra.mrb[0].mxu0 %vm343_vm3, %v3400_v42  ;;  %3542 = vmatprep.mubr.msk.f32.mxu1 %vm3672_vm0, %v3671_v0 }
  0xa4   : > { %v970_v47 = vsel %vm958_vm5, %v967_v45, %v963_v40  ;;  %v968_v48 = vsel %vm958_vm5, %v965_v46, %v967_v45  ;;  %v969_v49 = vsel %vm958_vm5, %v963_v40, %v965_v46  ;;  %1200 = vmatprep.mubr.f32.mxu0 %v3671_v0 }
  0xa5   : > { %3406 = vmatprep.subr.msk.mxu0 %vm277_vm1, %v969_v49  ;;  %3541 = vmatpush3.msk.msra.mxu1 %vm277_vm1, %v968_v48 }
  0xa6   : > { %3407 = vmatpush1.msk.msra.mxu0 %vm277_vm1, %v970_v47  ;;  %3543 = vmatmul.mubr.msk.f32.vlgmr.msra.gmra.mrb[10].mxu1 %vm343_vm3, %v3400_v42 }
  0xa7   : > { %v1285_v50 = vpop.permute.xlu1 %1284  ;;  %v1283_v51 = vpop.permute.xlu0 %1282  ;;  %3408 = vmatmul.mubr.msk.f32.vlgmr.msra.gmra.mrb[2].mxu0 %vm343_vm3, %v3400_v42  ;;  %3545 = vmatprep.subr.mxu1 %v3671_v0 }
  0xa8   : > { %v1290_v52 = vsel %vm1288_vm6, %v1283_v51, %v1285_v50  ;;  %3547 = vmatprep.mubr.msk.f32.mxu1 %vm3672_vm0, %v3671_v0  ;;  %1377 = vmatprep.mubr.f32.mxu0 %v3671_v0 }
  0xa9   : > { %3412 = vmatprep.subr.msk.mxu0 %vm277_vm1, %v1290_v52 }
  0xab   : > { %v1293_v53 = vpop.permute.xlu1 %1292  ;;  %v1287_v54 = vpop.permute.xlu0 %1286 }
  0xac   : > { %v1289_v56 = vsel %vm1288_vm6, %v1285_v50, %v1287_v54  ;;  %v1291_v57 = vsel %vm1288_vm6, %v1287_v54, %v1283_v51  ;;  %v3466_v51 = vld [vmem:[%s4130_s3 + $0x40] sm:$0xff] }
  0xad   : > { %3413 = vmatpush1.msk.msra.mxu0 %vm277_vm1, %v1291_v57  ;;  %3546 = vmatpush3.msk.msra.mxu1 %vm277_vm1, %v1289_v56 }
  0xae   : > { %3548 = vmatmul.mubr.msk.f32.vlgmr.msra.gmra.mrb[12].mxu1 %vm343_vm3, %v3411_v55  ;;  %3414 = vmatmul.mubr.msk.f32.vlgmr.msra.gmra.mrb[0].mxu0 %vm343_vm3, %v3411_v55 }
  0xaf   : > { %v1297_v58 = vpop.permute.xlu1 %1296  ;;  %v1295_v59 = vpop.permute.xlu0 %1294  ;;  %3550 = vmatprep.subr.mxu1 %v3671_v0  ;;  %3552 = vmatprep.mubr.msk.f32.mxu1 %vm3672_vm0, %v3671_v0 }
  0xb0   : > { %v1300_v60 = vsel %vm1288_vm6, %v1297_v58, %v1293_v53  ;;  %v1298_v61 = vsel %vm1288_vm6, %v1295_v59, %v1297_v58  ;;  %v1299_v62 = vsel %vm1288_vm6, %v1293_v53, %v1295_v59  ;;  %1530 = vmatprep.mubr.f32.mxu0 %v3671_v0  ;;  %v270_v59 = vsub.f32 %v3735_v2, %v3748_v4 }
  0xb1   : > { %3417 = vmatprep.subr.msk.mxu0 %vm277_vm1, %v1299_v62  ;;  %3551 = vmatpush3.msk.msra.mxu1 %vm277_vm1, %v1298_v61  ;;  %v273_v62 = vmul.f32 %v271_v10, %v271_v10 }
  0xb2   : > { %3418 = vmatpush1.msk.msra.mxu0 %vm277_vm1, %v1300_v60  ;;  %3553 = vmatmul.mubr.msk.f32.vlgmr.msra.gmra.mrb[14].mxu1 %vm343_vm3, %v3411_v55  ;;  %v272_v60 = vmul.f32 %v270_v59, %v270_v59 }
  0xb3   : > { %v1922_v63 = vpop.permute.xlu1 %1921  ;;  %3419 = vmatmul.mubr.msk.f32.vlgmr.msra.gmra.mrb[2].mxu0 %vm343_vm3, %v3411_v55  ;;  %v1920_v7 = vpop.permute.xlu0 %1919  ;;  %3423 = vmatprep.subr.msk.mxu0 %vm277_vm1, %v3741_v3 }
  0xb4   : > { %3555 = vmatprep.subr.mxu1 %v3671_v0  ;;  %3424 = vmatpush1.msk.msra.mxu0 %vm277_vm1, %v3735_v2  ;;  %v1924_v12 = vsel %vm1923_vm7, %v1920_v7, %v1922_v63  ;;  %v275_v61 = vcombine.high %v272_v60, %v272_v60 }
  0xb5   : > { %3556 = vmatpush3.msk.msra.mxu1 %vm277_vm1, %v3733_v1  ;;  %3557 = vmatprep.mubr.msk.f32.mxu1 %vm3672_vm0, %v3671_v0 }
  0xb6   : > { %1685 = vmatprep.mubr.f32.mxu0 %v3671_v0  ;;  %3558 = vmatmul.mubr.msk.f32.vlgmr.msra.gmra.mrb[16].mxu1 %vm343_vm3, %v3422_v8 }
  0xb7   : > { %3428 = vmatprep.subr.msk.mxu0 %vm277_vm1, %v3754_v5  ;;  %v1930_v3 = vpop.permute.xlu1 %1929  ;;  %3425 = vmatmul.mubr.msk.f32.vlgmr.msra.gmra.mrb[0].mxu0 %vm343_vm3, %v3422_v8  ;;  %v1918_v11 = vpop.permute.xlu0 %1917 }
  0xb8   : > { %3429 = vmatpush1.msk.msra.mxu0 %vm277_vm1, %v3748_v4  ;;  %3560 = vmatprep.subr.mxu1 %v3671_v0  ;;  %v1926_v13 = vsel %vm1923_vm7, %v1922_v63, %v1918_v11  ;;  %v1925_v15 = vsel %vm1923_vm7, %v1918_v11, %v1920_v7  ;;  %v279_v63 = vsel %vm277_vm1, %v275_v61, 0.0 }
  0xb9   : > { %3561 = vmatpush3.msk.msra.mxu1 %vm277_vm1, %v3758_v6  ;;  %3434 = vmatprep.subr.msk.mxu0 %vm277_vm1, %v1924_v12 }
  0xba   : > { %3562 = vmatprep.mubr.msk.f32.mxu1 %vm3672_vm0, %v3671_v0  ;;  %3565 = vmatprep.subr.mxu1 %v3671_v0 }
  0xbb   : > { %1835 = vmatprep.mubr.f32.mxu0 %v3671_v0  ;;  %3563 = vmatmul.mubr.msk.f32.vlgmr.msra.gmra.mrb[18].mxu1 %vm343_vm3, %v3422_v8  ;;  %v1928_v5 = vpop.permute.xlu1 %1927  ;;  %v1932_v14 = vpop.permute.xlu0 %1931 }
  0xbc   : > { %3566 = vmatpush3.msk.msra.mxu1 %vm277_vm1, %v1926_v13  ;;  %3430 = vmatmul.mubr.msk.f32.vlgmr.msra.gmra.mrb[2].mxu0 %vm343_vm3, %v3422_v8  ;;  %v1933_v16 = vsel %vm1923_vm7, %v1930_v3, %v1932_v14  ;;  %v1935_v18 = vsel %vm1923_vm7, %v1932_v14, %v1928_v5  ;;  %v1934_v21 = vsel %vm1923_vm7, %v1928_v5, %v1930_v3  ;;  %v281_v8 = vsel %vm277_vm1, %v273_v62, 0.0 }
  0xbd   : > { %3435 = vmatpush1.msk.msra.mxu0 %vm277_vm1, %v1925_v15  ;;  %3567 = vmatprep.mubr.msk.f32.mxu1 %vm3672_vm0, %v3671_v0 }
  0xbe   : > { %3439 = vmatprep.subr.msk.mxu0 %vm277_vm1, %v1933_v16  ;;  %3570 = vmatprep.subr.mxu1 %v3671_v0 }
  0xbf   : > { %2012 = vmatprep.mubr.f32.mxu0 %v3671_v0  ;;  %3568 = vmatmul.mubr.msk.f32.vlgmr.msra.gmra.mrb[20].mxu1 %vm343_vm3, %v3433_v17  ;;  %v2252_v19 = vpop.permute.xlu1 %2251  ;;  %v2250_v20 = vpop.permute.xlu0 %2249 }
  0xc0   : > { %3571 = vmatpush3.msk.msra.mxu1 %vm277_vm1, %v1935_v18  ;;  %3436 = vmatmul.mubr.msk.f32.vlgmr.msra.gmra.mrb[0].mxu0 %vm343_vm3, %v3433_v17  ;;  %v2254_v22 = vsel %vm2253_vm8, %v2250_v20, %v2252_v19 }
  0xc1   : > { %3440 = vmatpush1.msk.msra.mxu0 %vm277_vm1, %v1934_v21  ;;  %3572 = vmatprep.mubr.msk.f32.mxu1 %vm3672_vm0, %v3671_v0 }
  0xc2   : > { %3445 = vmatprep.subr.msk.mxu0 %vm277_vm1, %v2254_v22  ;;  %2165 = vmatprep.mubr.f32.mxu0 %v3671_v0 }
  0xc3   : > { %3573 = vmatmul.mubr.msk.f32.vlgmr.msra.gmra.mrb[22].mxu1 %vm343_vm3, %v3433_v17  ;;  %v2260_v23 = vpop.permute.xlu1 %2259  ;;  %v2248_v24 = vpop.permute.xlu0 %2247  ;;  %3575 = vmatprep.subr.mxu1 %v3671_v0 }
  0xc4   : > { %v2255_v25 = vsel %vm2253_vm8, %v2248_v24, %v2250_v20  ;;  %v2256_v26 = vsel %vm2253_vm8, %v2252_v19, %v2248_v24  ;;  %3441 = vmatmul.mubr.msk.f32.vlgmr.msra.gmra.mrb[2].mxu0 %vm343_vm3, %v3433_v17  ;;  %3577 = vmatprep.mubr.msk.f32.mxu1 %vm3672_vm0, %v3671_v0 }
  0xc5   : > { %3446 = vmatpush1.msk.msra.mxu0 %vm277_vm1, %v2255_v25  ;;  %3576 = vmatpush3.msk.msra.mxu1 %vm277_vm1, %v2256_v26 }
  0xc6   : > { %3580 = vmatprep.subr.mxu1 %v3671_v0  ;;  %2342 = vmatprep.mubr.f32.mxu0 %v3671_v0 }
  0xc7   : > { %3578 = vmatmul.mubr.msk.f32.vlgmr.msra.gmra.mrb[24].mxu1 %vm343_vm3, %v3444_v27  ;;  %v2258_v28 = vpop.permute.xlu1 %2257  ;;  %v2262_v29 = vpop.permute.xlu0 %2261 }
  0xc8   : > { %v2264_v30 = vsel %vm2253_vm8, %v2258_v28, %v2260_v23  ;;  %v2263_v31 = vsel %vm2253_vm8, %v2260_v23, %v2262_v29  ;;  %v2265_v32 = vsel %vm2253_vm8, %v2262_v29, %v2258_v28  ;;  %3582 = vmatprep.mubr.msk.f32.mxu1 %vm3672_vm0, %v3671_v0  ;;  %3447 = vmatmul.mubr.msk.f32.vlgmr.msra.gmra.mrb[0].mxu0 %vm343_vm3, %v3444_v27 }
  0xc9   : > { %3450 = vmatprep.subr.msk.mxu0 %vm277_vm1, %v2263_v31  ;;  %3581 = vmatpush3.msk.msra.mxu1 %vm277_vm1, %v2265_v32 }
  0xca   : > { %3451 = vmatpush1.msk.msra.mxu0 %vm277_vm1, %v2264_v30  ;;  %2495 = vmatprep.mubr.f32.mxu0 %v3671_v0 }
  0xcb   : > { %3583 = vmatmul.mubr.msk.f32.vlgmr.msra.gmra.mrb[26].mxu1 %vm343_vm3, %v3444_v27  ;;  %v2582_v33 = vpop.permute.xlu1 %2581  ;;  %v2580_v34 = vpop.permute.xlu0 %2579  ;;  %3585 = vmatprep.subr.mxu1 %v3671_v0 }
  0xcc   : > { %v2584_v35 = vsel %vm2583_vm9, %v2580_v34, %v2582_v33  ;;  %3452 = vmatmul.mubr.msk.f32.vlgmr.msra.gmra.mrb[2].mxu0 %vm343_vm3, %v3444_v27  ;;  %3587 = vmatprep.mubr.msk.f32.mxu1 %vm3672_vm0, %v3671_v0 }
  0xcd   : > { %3456 = vmatprep.subr.msk.mxu0 %vm277_vm1, %v2584_v35  ;;  %2672 = vmatprep.mubr.f32.mxu0 %v3671_v0 }
  0xcf   : > { %v2590_v36 = vpop.permute.xlu1 %2589  ;;  %v2578_v37 = vpop.permute.xlu0 %2577 }
  0xd0   : > { %v2585_v39 = vsel %vm2583_vm9, %v2578_v37, %v2580_v34  ;;  %v2586_v40 = vsel %vm2583_vm9, %v2582_v33, %v2578_v37 }
  0xd1   : > { %3457 = vmatpush1.msk.msra.mxu0 %vm277_vm1, %v2585_v39  ;;  %3586 = vmatpush3.msk.msra.mxu1 %vm277_vm1, %v2586_v40 }
  0xd2   : > { %3588 = vmatmul.mubr.msk.f32.vlgmr.msra.gmra.mrb[28].mxu1 %vm343_vm3, %v3455_v38  ;;  %3590 = vmatprep.subr.mxu1 %v3671_v0 }
  0xd3   : > { %v2588_v41 = vpop.permute.xlu1 %2587  ;;  %v2592_v42 = vpop.permute.xlu0 %2591  ;;  %3592 = vmatprep.mubr.msk.f32.mxu1 %vm3672_vm0, %v3671_v0  ;;  %3458 = vmatmul.mubr.msk.f32.vlgmr.msra.gmra.mrb[0].mxu0 %vm343_vm3, %v3455_v38 }
  0xd4   : > { %v2594_v43 = vsel %vm2583_vm9, %v2588_v41, %v2590_v36  ;;  %v2593_v44 = vsel %vm2583_vm9, %v2590_v36, %v2592_v42  ;;  %v2595_v45 = vsel %vm2583_vm9, %v2592_v42, %v2588_v41  ;;  %2825 = vmatprep.mubr.f32.mxu0 %v3671_v0 }
  0xd5   : > { %3461 = vmatprep.subr.msk.mxu0 %vm277_vm1, %v2593_v44  ;;  %3591 = vmatpush3.msk.msra.mxu1 %vm277_vm1, %v2595_v45 }
  0xd6   : > { %3462 = vmatpush1.msk.msra.mxu0 %vm277_vm1, %v2594_v43  ;;  %3593 = vmatmul.mubr.msk.f32.vlgmr.msra.gmra.mrb[30].mxu1 %vm343_vm3, %v3455_v38 }
  0xd7   : > { %v2912_v46 = vpop.permute.xlu1 %2911  ;;  %v2910_v47 = vpop.permute.xlu0 %2909  ;;  %3463 = vmatmul.mubr.msk.f32.vlgmr.msra.gmra.mrb[2].mxu0 %vm343_vm3, %v3455_v38  ;;  %3595 = vmatprep.subr.mxu1 %v3671_v0 }
  0xd8   : > { %v2914_v48 = vsel %vm2913_vm10, %v2910_v47, %v2912_v46  ;;  %3002 = vmatprep.mubr.f32.mxu0 %v3671_v0  ;;  %3597 = vmatprep.mubr.msk.f32.mxu1 %vm3672_vm0, %v3671_v0 }
  0xd9   : > { %3467 = vmatprep.subr.msk.mxu0 %vm277_vm1, %v2914_v48 }
  0xdb   : > { %v2920_v49 = vpop.permute.xlu1 %2919  ;;  %v2908_v50 = vpop.permute.xlu0 %2907 }
  0xdc   : > { %v2915_v52 = vsel %vm2913_vm10, %v2908_v50, %v2910_v47  ;;  %v2916_v53 = vsel %vm2913_vm10, %v2912_v46, %v2908_v50 }
  0xdd   : > { %3468 = vmatpush1.msk.msra.mxu0 %vm277_vm1, %v2915_v52  ;;  %3596 = vmatpush3.msk.msra.mxu1 %vm277_vm1, %v2916_v53 }
  0xde   : > { %3469 = vmatmul.mubr.msk.f32.vlgmr.msra.gmra.mrb[0].mxu0 %vm343_vm3, %v3466_v51  ;;  %3598 = vmatmul.mubr.msk.f32.vlgmr.msra.gmra.mrb[32].mxu1 %vm343_vm3, %v3466_v51 }
  0xdf   : > { %v2918_v54 = vpop.permute.xlu1 %2917  ;;  %v2922_v55 = vpop.permute.xlu0 %2921  ;;  %3600 = vmatprep.subr.mxu1 %v3671_v0  ;;  %3602 = vmatprep.mubr.msk.f32.mxu1 %vm3672_vm0, %v3671_v0 }
  0xe0   : > { %v2924_v56 = vsel %vm2913_vm10, %v2918_v54, %v2920_v49  ;;  %v2923_v57 = vsel %vm2913_vm10, %v2920_v49, %v2922_v55  ;;  %v2925_v58 = vsel %vm2913_vm10, %v2922_v55, %v2918_v54  ;;  %3155 = vmatprep.mubr.f32.mxu0 %v3671_v0  ;;  %v278_v0 = vsel %vm277_vm1, %v272_v60, 0.0 }
  0xe1   : > { %3472 = vmatprep.subr.msk.mxu0 %vm277_vm1, %v2923_v57  ;;  %3601 = vmatpush3.msk.msra.mxu1 %vm277_vm1, %v2925_v58  ;;  %v280_v7 = vadd.f32 %v279_v63, %v278_v0  ;;  %v4109_v58 = vshrl.u32 %v303_v9, 7 }
  0xe2   : > { %3473 = vmatpush1.msk.msra.mxu0 %vm277_vm1, %v2924_v56  ;;  %3603 = vmatmul.mubr.msk.f32.vlgmr.msra.gmra.mrb[34].mxu1 %vm343_vm3, %v3466_v51 }
  0xe3   : > { %3474 = vmatmul.mubr.msk.f32.vlgmr.msra.gmra.mrb[2].mxu0 %vm343_vm3, %v3466_v51  ;;  %v282_v3 = vadd.f32 %v281_v8, %v280_v7  ;;  %v3267_v9 = vsub.s32 1, %v4109_v58  ;;  %vm3292_vm11 = vcmp.eq.s32.totalorder %v4109_v58, 0 }
  0xe5   : > { %283 = vadd.xlane.f32.xlu1 %v282_v3  ;;  %v3263_v3 = vsub.s32 0, %v4109_v58 }
  0xf0   : > { %v3239_v52 = vpop.permute.xlu0 %3238 }
 0x15e   : > { %v493_v11 = vpop.f32.mrb[0].mxu1 }
 0x15f   : > { %v3519_v12 = vpop.f32.mrb[1].mxu1 }
 0x162   : > { %v646_v13 = vpop.f32.mrb[2].mxu1 }
 0x163   : > { %v647_v5 = vadd.f32 %v646_v13, %v493_v11  ;;  %v3524_v2 = vpop.f32.mrb[3].mxu1  ;;  %v3259_v13 = vld [vmem:[%s260_s11] sm:$0x7] }
 0x169   : > { %v796_v4 = vpop.f32.mrb[4].mxu1 }
 0x16a   : > { %v3529_v14 = vpop.f32.mrb[5].mxu1 }
 0x16e   : > { %v946_v15 = vpop.f32.mrb[6].mxu1 }
 0x16f   : > { %v947_v1 = vadd.f32 %v946_v15, %v796_v4  ;;  %v3534_v6 = vpop.f32.mrb[7].mxu1  ;;  %v3271_v4 = vsub.s32 2, %v4109_v58 }
 0x175   : > { %v1120_v16 = vpop.f32.mrb[8].mxu1 }
 0x176   : > { %v1126_v17 = vadd.f32 %v1120_v16, %v647_v5  ;;  %v3539_v18 = vpop.f32.mrb[9].mxu1 }
 0x179   : > { %v1273_v19 = vpop.f32.mrb[10].mxu1 }
 0x17a   : > { %v1279_v20 = vadd.f32 %v1273_v19, %v947_v1  ;;  %v3544_v21 = vpop.f32.mrb[11].mxu1 }
 0x181   : > { %v1450_v22 = vpop.f32.mrb[12].mxu1 }
 0x182   : > { %v1456_v23 = vadd.f32 %v1450_v22, %v1126_v17  ;;  %v3549_v24 = vpop.f32.mrb[13].mxu1  ;;  %v3264_v17 = vrot.slane %v3259_v13, %v3263_v3 }
 0x183   : > { %v3272_v24 = vrot.slane %v3259_v13, %v3271_v4 }
 0x185   : > { %v1603_v25 = vpop.f32.mrb[14].mxu1 }
 0x186   : > { %v1609_v26 = vadd.f32 %v1603_v25, %v1279_v20  ;;  %v3554_v27 = vpop.f32.mrb[15].mxu1  ;;  %v3268_v20 = vrot.slane %v3259_v13, %v3267_v9 }
 0x189   : > { %v1758_v28 = vpop.f32.mrb[16].mxu1 }
 0x18a   : > { %v1764_v29 = vadd.f32 %v1758_v28, %v1456_v23  ;;  %v3559_v30 = vpop.f32.mrb[17].mxu1 }
 0x18b   : > { %v284_v30 = vpop.xlane.xlu1 %283 }
 0x18e   : > { %v1908_v31 = vpop.f32.mrb[18].mxu1 }
 0x18f   : > { %v1914_v32 = vadd.f32 %v1908_v31, %v1609_v26  ;;  %v3564_v33 = vpop.f32.mrb[19].mxu1  ;;  %v285_v31 = vrot.slane %v284_v30, 4 }
 0x192   : > { %v2085_v34 = vpop.f32.mrb[20].mxu1 }
 0x193   : > { %v2091_v35 = vadd.f32 %v2085_v34, %v1764_v29  ;;  %v3569_v36 = vpop.f32.mrb[21].mxu1 }
 0x196   : > { %v2238_v37 = vpop.f32.mrb[22].mxu1 }
 0x197   : > { %v2244_v38 = vadd.f32 %v2238_v37, %v1914_v32  ;;  %v3574_v39 = vpop.f32.mrb[23].mxu1  ;;  %v286_v32 = vadd.f32 %v285_v31, %v284_v30 }
 0x199   : > { %v287_v33 = vrot.slane %v286_v32, 2 }
 0x19a   : > { %v2415_v40 = vpop.f32.mrb[24].mxu1 }
 0x19b   : > { %v2421_v41 = vadd.f32 %v2415_v40, %v2091_v35  ;;  %v3579_v42 = vpop.f32.mrb[25].mxu1  ;;  %v288_v34 = vadd.f32 %v287_v33, %v286_v32 }
 0x19d   : > { %v289_v35 = vrot.slane %v288_v34, 1 }
 0x19e   : > { %v2568_v43 = vpop.f32.mrb[26].mxu1 }
 0x19f   : > { %v2574_v44 = vadd.f32 %v2568_v43, %v2244_v38  ;;  %v3584_v45 = vpop.f32.mrb[27].mxu1  ;;  %v290_v36 = vadd.f32 %v289_v35, %v288_v34 }
 0x1a1   : > { %3637 = vpush %v290_v36 }
 0x1a5   : > { %v2745_v46 = vpop.f32.mrb[28].mxu1 }
 0x1a6   : > { %v2751_v47 = vadd.f32 %v2745_v46, %v2421_v41  ;;  %v3589_v48 = vpop.f32.mrb[29].mxu1 }
 0x1a9   : > { %v2898_v49 = vpop.f32.mrb[30].mxu1 }
 0x1aa   : > { %v2904_v50 = vadd.f32 %v2898_v49, %v2574_v44  ;;  %v3594_v51 = vpop.f32.mrb[31].mxu1 }
 0x1b1   : > { %v3004_v53 = vpop.f32.mrb[0].mxu0  ;;  %v3075_v54 = vpop.f32.mrb[32].mxu1 }
 0x1b2   : > { %v3081_v55 = vadd.f32 %v3075_v54, %v2751_v47  ;;  %v3006_v56 = vpop.f32.mrb[1].mxu0  ;;  %v3599_v57 = vpop.f32.mrb[33].mxu1  ;;  %v3241_v60 = vadd.f32 %v3239_v52, %v3004_v53 }
 0x1b3   : > { %v3242_v10 = vadd.f32 %v3239_v52, %v3006_v56 }
 0x1b4   : > { %v3243_v62 = vadd.f32 %v3239_v52, %v3081_v55  ;;  %v3244_v5 = vmax.f32 %v3241_v60, 0.0 }
 0x1b5   : > { %v3228_v59 = vpop.f32.mrb[34].mxu1  ;;  %v3245_v14 = vmax.f32 %v3242_v10, 0.0 }
 0x1b6   : > { %v3234_v61 = vadd.f32 %v3228_v59, %v2904_v50  ;;  %v3157_v0 = vpop.f32.mrb[2].mxu0  ;;  %v3604_v63 = vpop.f32.mrb[35].mxu1  ;;  %v3246_v15 = vmax.f32 %v3243_v62, 0.0 }
 0x1b7   : > { %v3247_v7 = vadd.f32 %v3239_v52, %v3157_v0  ;;  %v3159_v8 = vpop.f32.mrb[3].mxu0 }
 0x1b8   : > { %v3249_v11 = vadd.f32 %v3239_v52, %v3234_v61  ;;  %v3248_v12 = vadd.f32 %v3239_v52, %v3159_v8 }
 0x1b9   : > { %v3250_v2 = vmax.f32 %v3247_v7, 0.0 }
 0x1ba   : > { %v3252_v1 = vmax.f32 %v3249_v11, 0.0  ;;  %v3251_v6 = vmax.f32 %v3248_v12, 0.0 }
 0x1bb   : > { %v3253_v16 = vsub.f32 %v3244_v5, %v3250_v2 }
 0x1bc   : > { %v3255_v18 = vsub.f32 %v3246_v15, %v3252_v1  ;;  %v3254_v19 = vsub.f32 %v3245_v14, %v3251_v6 }
 0x1bd   : > { %v3256_v21 = vmul.f32 %v3253_v16, %v3253_v16 }
 0x1be   : > { %v3257_v22 = vmul.f32 %v3254_v19, %v3254_v19  ;;  %v3258_v23 = vmul.f32 %v3255_v18, %v3255_v18 }
 0x1bf   : > { %v3276_v25 = vmul.f32 %v3264_v17, %v3256_v21 }
 0x1c0   : > { %v3277_v26 = vmul.f32 %v3268_v20, %v3257_v22  ;;  %v3278_v27 = vmul.f32 %v3272_v24, %v3258_v23 }
 0x1c2   : > { %v3279_v28 = vadd.f32 %v3277_v26, %v3276_v25 }
 0x1c4   : > { %v3280_v29 = vadd.f32 %v3279_v28, %v3278_v27 }
 0x1c6   : > { %3281 = vadd.xlane.f32.xlu0 %v3280_v29 }
 0x1d2   : > { %s3638_s12 = spop %3637 }
 0x1d3   : > { %v3293_v44 = vstv %s3638_s12 }
 0x253   : > { %v3282_v37 = vpop.xlane.xlu0 %3281 }
 0x254   : > { %v3283_v38 = vrot.slane %v3282_v37, 4 }
 0x256   : > { %v3284_v39 = vadd.f32 %v3283_v38, %v3282_v37 }
 0x258   : > { %v3285_v40 = vrot.slane %v3284_v39, 2 }
 0x25a   : > { %v3286_v41 = vadd.f32 %v3285_v40, %v3284_v39 }
 0x25c   : > { %v3287_v42 = vrot.slane %v3286_v41, 1 }
 0x25e   : > { %v3288_v43 = vadd.f32 %v3287_v42, %v3286_v41 }
 0x260   : > { %3639 = vpush %v3288_v43 }
 0x291   : > { %s3640_s16 = spop %3639 }
 0x292   : > { %v3294_v45 = vstv %s3640_s16 }
 0x293   : > { %v3295_v46 = vsel %vm3292_vm11, %v3293_v44, %v3294_v45 }
 0x294   : > { %3296 = vst [vmem:[%s265_s15] sm:$0x3] %v3295_v46 }
 0x295 PF: > { %s15_s18 = sadd.s32 1, %s3669_s18  }
 0x296   : > { %p12_p5 = scmp.ge.s32.totalorder %s15_s18, 4  }
 0x298   :  { %14 = sbr.rel (!%p12_p5) target bundleno = 1 (0x1), region = 84 }

</bundles_post_ra>
